<compile_context>
chip_gen: v5e
topology: v5e:2x2
jax: 0.10.0
libtpu: 0.0.40
codegen_flags: <defaults>
</compile_context>

<pallas_src>
import functools

import jax
import jax.numpy as jnp
from jax.experimental import pallas as pl
from jax.experimental.pallas import tpu as pltpu

_EPS = 1e-5          # nn.BatchNorm1d default eps
_LANES = 128
_SUBLANES = 8


def _fused_predictor_kernel(xf_ref, gb_ref, w1_ref, w2_ref, o_ref, *, n_logical):
    # xf: (Np, K)  K = C*L (torch.flatten(x, 1) layout); rows >= n_logical are zero
    # gb: (2, C)   row 0 = gamma, row 1 = beta
    # w1: (K, Hp)  zero-padded, lane-dense
    # w2: (Hp, Op) zero-padded, lane-dense
    _, k = xf_ref.shape
    c = gb_ref.shape[1]
    l = k // c

    xf = xf_ref[...]                                             # (Np, K) f32

    # ---- one-hot channel-membership matrices from 2-D iota (stays 2-D / lane-dense)
    # TODO(synk): at realistic K*C, pass g/gt as precomputed constant inputs instead
    # of rebuilding O(K*C) VPU work per call.
    k_ids_g = jax.lax.broadcasted_iota(jnp.int32, (k, c), 0)
    c_lo_g = jax.lax.broadcasted_iota(jnp.int32, (k, c), 1) * l
    g = jnp.logical_and(k_ids_g >= c_lo_g, k_ids_g < c_lo_g + l).astype(jnp.float32)   # (K, C)

    k_ids_t = jax.lax.broadcasted_iota(jnp.int32, (c, k), 1)
    c_lo_t = jax.lax.broadcasted_iota(jnp.int32, (c, k), 0) * l
    gt = jnp.logical_and(k_ids_t >= c_lo_t, k_ids_t < c_lo_t + l).astype(jnp.float32)  # (C, K)

    # ---- BatchNorm1d batch statistics, per channel (fused: one (2,K)@(K,C) dot) ----
    sums = jnp.concatenate(
        [jnp.sum(xf, axis=0, keepdims=True),
         jnp.sum(xf * xf, axis=0, keepdims=True)], axis=0)       # (2, K)
    ch = jnp.dot(sums, g, preferred_element_type=jnp.float32)    # (2, C)

    cnt = jnp.float32(n_logical * l)      # logical N: zero-padded rows don't count
    mean = ch[0:1, :] / cnt
    var = ch[1:2, :] / cnt - mean * mean  # biased variance (training-mode BN)
    # TODO(synk): switch to a mean-shifted two-pass variance before scaling to real
    # data distributions (E[x^2]-E[x]^2 cancels catastrophically when |mean| >> std).

    gamma = gb_ref[0:1, :]                                       # (1, C)
    beta = gb_ref[1:2, :]                                        # (1, C)
    s = gamma * jax.lax.rsqrt(var + _EPS)                        # (1, C)
    t = beta - mean * s                                          # (1, C)

    # ---- expand per-channel scale/shift to per-flattened-feature (fused dot) ----
    st = jnp.concatenate([s, t], axis=0)                             # (2, C)
    st_flat = jnp.dot(st, gt, preferred_element_type=jnp.float32)    # (2, K)
    s_flat = st_flat[0:1, :]
    t_flat = st_flat[1:2, :]

    # ---- BN folded into the bias-free MLP (exact); shift as a (1, Hp) bias row ----
    xs = xf * s_flat                                                         # (Np, K)
    h = jnp.dot(xs, w1_ref[...], preferred_element_type=jnp.float32)         # (Np, Hp)
    bias = jnp.dot(t_flat, w1_ref[...], preferred_element_type=jnp.float32)  # (1, Hp)
    h = jnp.maximum(h + bias, 0.0)                                           # ReLU
    o_ref[...] = jnp.dot(h, w2_ref[...],
                         preferred_element_type=jnp.float32).astype(o_ref.dtype)


def build_predictor_params(gamma, beta, w1, w2):
    """One-time packing/padding (hoisted out of the forward path).

    w1: torch layout (H, C*L); w2: torch layout (O, H).
    """
    h_dim, k = w1.shape
    o_dim = w2.shape[0]
    hp = pl.cdiv(h_dim, _LANES) * _LANES
    op = pl.cdiv(o_dim, _LANES) * _LANES
    gb = jnp.stack([gamma, beta]).astype(jnp.float32)                         # (2, C)
    w1_p = jnp.zeros((k, hp), jnp.float32).at[:, :h_dim].set(w1.T)            # (K, Hp)
    w2_p = jnp.zeros((hp, op), jnp.float32).at[:h_dim, :o_dim].set(w2.T)      # (Hp, Op)
    return {"gb": gb, "w1_p": w1_p, "w2_p": w2_p, "h": h_dim, "o": o_dim}


def predictor_block_forward(x, params):
    """x: (N, C, L) f32. params: output of build_predictor_params (constants)."""
    n, c, l = x.shape
    k = c * l
    o_dim = params["o"]
    op = params["w2_p"].shape[1]

    # torch.flatten(x, 1) + zero-pad the batch to a full 8-sublane tile (exact: zero
    # rows contribute nothing to the channel sums; cnt in-kernel uses logical N).
    n_pad = pl.cdiv(n, _SUBLANES) * _SUBLANES
    xf = jnp.pad(x.reshape(n, k), ((0, n_pad - n), (0, 0)))

    vmem = pl.BlockSpec(memory_space=pltpu.MemorySpace.VMEM)
    out_p = pl.pallas_call(
        functools.partial(_fused_predictor_kernel, n_logical=n),
        out_shape=jax.ShapeDtypeStruct((n_pad, op), x.dtype),
        in_specs=[vmem, vmem, vmem, vmem],
        out_specs=vmem,
    )(xf, params["gb"], params["w1_p"], params["w2_p"])
    return out_p[:n, :o_dim]


def _reference(x, gamma, beta, w1_t, w2_t):
    mean = jnp.mean(x, axis=(0, 2), keepdims=True)
    var = jnp.mean((x - mean) ** 2, axis=(0, 2), keepdims=True)
    xn = (x - mean) * jax.lax.rsqrt(var + _EPS)
    xn = xn * gamma.reshape(1, -1, 1) + beta.reshape(1, -1, 1)
    xf = xn.reshape(x.shape[0], -1)
    hh = jnp.maximum(xf @ w1_t, 0.0)
    return hh @ w2_t


if __name__ == "__main__":
    # Small config consistent with the module's forward.
    config = dict(in_channels=4, out_channels=3, window_obs=8, window_predict=6)
    N = 2
    C, L = config["in_channels"], config["window_obs"]
    H = config["in_channels"] * config["window_predict"]       # 24
    O = config["out_channels"] * config["window_predict"]      # 18

    key = jax.random.PRNGKey(0)
    kx, kw1, kw2, kg, kb = jax.random.split(key, 5)

    x = jax.random.normal(kx, (N, C, L), dtype=jnp.float32)

    # nn.init.uniform_(w, -0.1, 0.1) for both Linear layers in self.lin; no biases.
    w1 = jax.random.uniform(kw1, (H, C * L), minval=-0.1, maxval=0.1,
                            dtype=jnp.float32)                  # torch layout (out, in)
    w2 = jax.random.uniform(kw2, (O, H), minval=-0.1, maxval=0.1,
                            dtype=jnp.float32)

    # BatchNorm1d affine params (non-trivial values to exercise the BN fold).
    gamma = jax.random.uniform(kg, (C,), minval=0.5, maxval=1.5, dtype=jnp.float32)
    beta = 0.1 * jax.random.normal(kb, (C,), dtype=jnp.float32)

    # One-time param packing (hoisted out of the forward path).
    params = build_predictor_params(gamma, beta, w1, w2)

    out = predictor_block_forward(x, params)
    out = jax.block_until_ready(out)

    ref = _reference(x, gamma, beta, w1.T, w2.T)
    assert out.shape == (N, O), out.shape
    assert jnp.allclose(out, ref, atol=1e-4, rtol=1e-4), "mismatch vs reference"

    print("KERNEL_OK")
</pallas_src>

<mosaic_0001>
module attributes {stable_mosaic.version = 11 : i64} {
  func.func @_fused_predictor_kernel(%arg0: memref<8x32xf32, #tpu.memory_space<vmem>>, %arg1: memref<2x4xf32, #tpu.memory_space<vmem>>, %arg2: memref<32x128xf32, #tpu.memory_space<vmem>>, %arg3: memref<128x128xf32, #tpu.memory_space<vmem>>, %arg4: memref<8x128xf32, #tpu.memory_space<vmem>>) attributes {dimension_semantics = [], scalar_prefetch = 0 : i64, scratch_operands = 0 : i64, tpu.core_type = #tpu.core_type<tc>} {
    %c0 = arith.constant 0 : index
    %c0_0 = arith.constant 0 : index
    %0 = vector.load %arg0[%c0, %c0_0] : memref<8x32xf32, #tpu.memory_space<vmem>>, vector<8x32xf32>
    %1 = tpu.iota {dimensions = array<i32: 0>} : vector<32x4xi32>
    %2 = tpu.iota {dimensions = array<i32: 1>} : vector<32x4xi32>
    %c8_i32 = arith.constant 8 : i32
    %3 = vector.broadcast %c8_i32 : i32 to vector<32x4xi32>
    %4 = arith.muli %2, %3 : vector<32x4xi32>
    %5 = arith.cmpi sge, %1, %4 : vector<32x4xi32>
    %c8_i32_1 = arith.constant 8 : i32
    %6 = vector.broadcast %c8_i32_1 : i32 to vector<32x4xi32>
    %7 = arith.addi %4, %6 : vector<32x4xi32>
    %8 = arith.cmpi slt, %1, %7 : vector<32x4xi32>
    %9 = arith.andi %5, %8 : vector<32x4xi1>
    %10 = arith.extui %9 : vector<32x4xi1> to vector<32x4xi32>
    %11 = arith.sitofp %10 : vector<32x4xi32> to vector<32x4xf32>
    %12 = tpu.iota {dimensions = array<i32: 1>} : vector<4x32xi32>
    %13 = tpu.iota {dimensions = array<i32: 0>} : vector<4x32xi32>
    %c8_i32_2 = arith.constant 8 : i32
    %14 = vector.broadcast %c8_i32_2 : i32 to vector<4x32xi32>
    %15 = arith.muli %13, %14 : vector<4x32xi32>
    %16 = arith.cmpi sge, %12, %15 : vector<4x32xi32>
    %c8_i32_3 = arith.constant 8 : i32
    %17 = vector.broadcast %c8_i32_3 : i32 to vector<4x32xi32>
    %18 = arith.addi %15, %17 : vector<4x32xi32>
    %19 = arith.cmpi slt, %12, %18 : vector<4x32xi32>
    %20 = arith.andi %16, %19 : vector<4x32xi1>
    %21 = arith.extui %20 : vector<4x32xi1> to vector<4x32xi32>
    %22 = arith.sitofp %21 : vector<4x32xi32> to vector<4x32xf32>
    %cst = arith.constant dense<0.000000e+00> : vector<32xf32>
    %23 = vector.multi_reduction <add>, %0, %cst [0] : vector<8x32xf32> to vector<32xf32>
    %24 = vector.shape_cast %23 : vector<32xf32> to vector<1x32xf32>
    %25 = arith.mulf %0, %0 : vector<8x32xf32>
    %cst_4 = arith.constant dense<0.000000e+00> : vector<32xf32>
    %26 = vector.multi_reduction <add>, %25, %cst_4 [0] : vector<8x32xf32> to vector<32xf32>
    %27 = vector.shape_cast %26 : vector<32xf32> to vector<1x32xf32>
    %28 = tpu.concatenate %24, %27 in 0 : vector<1x32xf32>, vector<1x32xf32> -> vector<2x32xf32>
    %cst_5 = arith.constant dense<0.000000e+00> : vector<2x4xf32>
    %29 = tpu.matmul %28, %11, %cst_5 {dimension_numbers = #tpu.dot_dimension_numbers<[1], [0], [0], [1], [0, 0, 1, 1], [], []>} : vector<2x32xf32>, vector<32x4xf32>, vector<2x4xf32> -> vector<2x4xf32>
    %30 = vector.extract_strided_slice %29 {offsets = [0, 0], sizes = [1, 4], strides = [1, 1]} : vector<2x4xf32> to vector<1x4xf32>
    %cst_6 = arith.constant 1.600000e+01 : f32
    %31 = vector.broadcast %cst_6 : f32 to vector<1x4xf32>
    %32 = arith.divf %30, %31 : vector<1x4xf32>
    %33 = vector.extract_strided_slice %29 {offsets = [1, 0], sizes = [1, 4], strides = [1, 1]} : vector<2x4xf32> to vector<1x4xf32>
    %cst_7 = arith.constant 1.600000e+01 : f32
    %34 = vector.broadcast %cst_7 : f32 to vector<1x4xf32>
    %35 = arith.divf %33, %34 : vector<1x4xf32>
    %36 = arith.mulf %32, %32 : vector<1x4xf32>
    %37 = arith.subf %35, %36 : vector<1x4xf32>
    %c0_8 = arith.constant 0 : index
    %c0_9 = arith.constant 0 : index
    %38 = vector.load %arg1[%c0_8, %c0_9] : memref<2x4xf32, #tpu.memory_space<vmem>>, vector<1x4xf32>
    %c1 = arith.constant 1 : index
    %c0_10 = arith.constant 0 : index
    %39 = vector.load %arg1[%c1, %c0_10] : memref<2x4xf32, #tpu.memory_space<vmem>>, vector<1x4xf32>
    %cst_11 = arith.constant 9.99999974E-6 : f32
    %40 = vector.broadcast %cst_11 : f32 to vector<1x4xf32>
    %41 = arith.addf %37, %40 : vector<1x4xf32>
    %42 = math.rsqrt %41 : vector<1x4xf32>
    %43 = arith.mulf %38, %42 : vector<1x4xf32>
    %44 = arith.mulf %32, %43 : vector<1x4xf32>
    %45 = arith.subf %39, %44 : vector<1x4xf32>
    %46 = tpu.concatenate %43, %45 in 0 : vector<1x4xf32>, vector<1x4xf32> -> vector<2x4xf32>
    %cst_12 = arith.constant dense<0.000000e+00> : vector<2x32xf32>
    %47 = tpu.matmul %46, %22, %cst_12 {dimension_numbers = #tpu.dot_dimension_numbers<[1], [0], [0], [1], [0, 0, 1, 1], [], []>} : vector<2x4xf32>, vector<4x32xf32>, vector<2x32xf32> -> vector<2x32xf32>
    %48 = vector.extract_strided_slice %47 {offsets = [0, 0], sizes = [1, 32], strides = [1, 1]} : vector<2x32xf32> to vector<1x32xf32>
    %49 = vector.extract_strided_slice %47 {offsets = [1, 0], sizes = [1, 32], strides = [1, 1]} : vector<2x32xf32> to vector<1x32xf32>
    %50 = vector.broadcast %48 : vector<1x32xf32> to vector<8x32xf32>
    %51 = arith.mulf %0, %50 : vector<8x32xf32>
    %c0_13 = arith.constant 0 : index
    %c0_14 = arith.constant 0 : index
    %52 = vector.load %arg2[%c0_13, %c0_14] : memref<32x128xf32, #tpu.memory_space<vmem>>, vector<32x128xf32>
    %cst_15 = arith.constant dense<0.000000e+00> : vector<8x128xf32>
    %53 = tpu.matmul %51, %52, %cst_15 {dimension_numbers = #tpu.dot_dimension_numbers<[1], [0], [0], [1], [0, 0, 1, 1], [], []>} : vector<8x32xf32>, vector<32x128xf32>, vector<8x128xf32> -> vector<8x128xf32>
    %c0_16 = arith.constant 0 : index
    %c0_17 = arith.constant 0 : index
    %54 = vector.load %arg2[%c0_16, %c0_17] : memref<32x128xf32, #tpu.memory_space<vmem>>, vector<32x128xf32>
    %cst_18 = arith.constant dense<0.000000e+00> : vector<1x128xf32>
    %55 = tpu.matmul %49, %54, %cst_18 {dimension_numbers = #tpu.dot_dimension_numbers<[1], [0], [0], [1], [0, 0, 1, 1], [], []>} : vector<1x32xf32>, vector<32x128xf32>, vector<1x128xf32> -> vector<1x128xf32>
    %56 = vector.broadcast %55 : vector<1x128xf32> to vector<8x128xf32>
    %57 = arith.addf %53, %56 : vector<8x128xf32>
    %cst_19 = arith.constant 0.000000e+00 : f32
    %58 = vector.broadcast %cst_19 : f32 to vector<8x128xf32>
    %59 = arith.maximumf %57, %58 : vector<8x128xf32>
    %c0_20 = arith.constant 0 : index
    %c0_21 = arith.constant 0 : index
    %60 = vector.load %arg3[%c0_20, %c0_21] : memref<128x128xf32, #tpu.memory_space<vmem>>, vector<128x128xf32>
    %cst_22 = arith.constant dense<0.000000e+00> : vector<8x128xf32>
    %61 = tpu.matmul %59, %60, %cst_22 {dimension_numbers = #tpu.dot_dimension_numbers<[1], [0], [0], [1], [0, 0, 1, 1], [], []>} : vector<8x128xf32>, vector<128x128xf32>, vector<8x128xf32> -> vector<8x128xf32>
    %c0_23 = arith.constant 0 : index
    %c0_24 = arith.constant 0 : index
    %62 = vector.load %arg4[%c0_23, %c0_24] : memref<8x128xf32, #tpu.memory_space<vmem>>, vector<8x128xf32>
    tpu.vector_store %arg4[%c0_23, %c0_24], %61 {strides = array<i32>} : memref<8x128xf32, #tpu.memory_space<vmem>>, vector<8x128xf32>,
    return
  }
}

</mosaic_0001>

<bundles_post_ra>
// kernel: tpu_custom_call.1
= control target key start
LH: loop header
LB: loop body
LE: loop exit
PB: predicated region body
PF: predicated region fallthrough
CT: control target
= control target key end

     0   :  { %9 = vsyncpa [#allocation3], 0  ;;  %s549_s0 = inlined_call_operand.hbm [shape: f32[8,32], index: 0, kind: input, shape index: {}]   ;;  %s550_s1 = inlined_call_operand.hbm [shape: f32[2,4], index: 1, kind: input, shape index: {}]   ;;  %s551_s2 = inlined_call_operand.hbm [shape: f32[32,128], index: 2, kind: input, shape index: {}]   ;;  %s552_s3 = inlined_call_operand.hbm [shape: f32[128,128], index: 3, kind: input, shape index: {}]   ;;  %s553_s4 = inlined_call_operand.hbm [shape: f32[8,128], index: 4, kind: output, shape index: {}]  }
   0x1   :  { %10 = vsyncpa [#allocation6], 0 }
   0x2   :  { %11 = vsyncpa [#allocation9], 0  ;;  %s29_s17 = sshll.u32 %s550_s1, 4  ;;  %s30_s17 = int_to_ptr.hbm [resolvable:$true] %s29_s17 }
   0x3   :  { %12 = vsyncpa [#allocation4], 0  ;;  %s486_s18 = smov [#allocation5]   ;;  %s18_s22 = sshll.u32 %s549_s0, 4  ;;  %s19_s22 = int_to_ptr.hbm [resolvable:$true] %s18_s22 }
   0x4   :  { %s31_s19 = sshll.u32 %s486_s18, 4  ;;  %s487_s23 = smov [#allocation2]   ;;  %s32_s19 = int_to_ptr.vmem [resolvable:$true] %s31_s19 }
   0x5   :  { %34 = dma.hbm_to_vmem [thread:$0]  %s30_s17, 32, %s32_s19, [#allocation6]  }
   0x6   :  { %s20_s24 = sshll.u32 %s487_s23, 4  ;;  %s39_s27 = sshll.u32 %s551_s2, 4  ;;  %s21_s24 = int_to_ptr.vmem [resolvable:$true] %s20_s24  ;;  %s40_s27 = int_to_ptr.hbm [resolvable:$true] %s39_s27 }
   0x7   :  { %23 = dma.hbm_to_vmem [thread:$0]  %s19_s22, 128, %s21_s24, [#allocation3]  }
   0x8   :  { %s488_s1 = smov [#allocation7]   ;;  %s52_s5 = sshll.u32 %s552_s3, 4  ;;  %s53_s5 = int_to_ptr.hbm [resolvable:$true] %s52_s5 }
   0x9   :  { %s41_s28 = sshll.u32 %s488_s1, 4  ;;  %s489_s6 = smov 128   ;;  %s42_s28 = int_to_ptr.vmem [resolvable:$true] %s41_s28 }
   0xa   :  { %s490_s0 = smov 8   ;;  %s491_s7 = smov [#allocation8]  }
   0xb   :  { %47 = dma.hbm_to_vmem [thread:$0]  %s40_s27, 512, %s42_s28, [#allocation6], %s489_s6, %s489_s6, %s490_s0  }
   0xc   :  { %s54_s8 = sshll.u32 %s491_s7, 4  ;;  %s55_s8 = int_to_ptr.vmem [resolvable:$true] %s54_s8 }
   0xd   :  { %60 = dma.hbm_to_vmem [thread:$0]  %s53_s5, 2048, %s55_s8, [#allocation9], %s489_s6, %s489_s6, %s490_s0  }
   0xe   :  { %478 = dma.done.wait [#allocation3], 128  }
   0xf   :  { %479 = vsyncadd [#allocation3], 4294967168 }
  0x10   :  { %480 = dma.done.wait [#allocation6], 544  }
  0x11   :  { %481 = vsyncadd [#allocation6], 4294966752 }
  0x12   :  { %482 = dma.done.wait [#allocation9], 2048  }
  0x13   :  { %483 = vsyncadd [#allocation9], 4294965248  ;;  %v78_v0 = vlaneseq  ;;  %vm114_vm1 = vcmask 261120   ;;  %v533_v8 = vld [vmem:[#allocation2] sm:$0xff]  ;;  %v492_v11 = vmov 1.0   ;;  %vm130_vm13 = vcmask 1040384  }
  0x14   :  { %v115_v9 = vsel %vm114_vm1, %v533_v8, 0.0  ;;  %v122_v10 = vmul.f32 %v533_v8, %v533_v8  ;;  %v493_v26 = vmov 16.0   ;;  %v494_v39 = vmov 0.0   ;;  %v224_v42 = vld [vmem:[#allocation7 + $0x18] sm:$0xff]  ;;  %v223_v43 = vld [vmem:[#allocation7 + $0x10] sm:$0xff]  ;;  %v222_v60 = vld [vmem:[#allocation7 + $0x8] sm:$0xff] }
  0x15   :  { %v79_v1 = vshrl.u32 %v78_v0, 7  ;;  %v84_v2 = vand.u32 127, %v78_v0  ;;  %v116_v12 = vrot.slane %v115_v9, 4  ;;  %354 = vrcp.f32 %v493_v26  ;;  %241 = vmatpush.msra.mxu2 %v224_v42  ;;  %265 = vmatpush.msra.mxu3 %v224_v42  ;;  %v168_v51 = vld [vmem:[#allocation5] sm:$0x1]  ;;  %v221_v61 = vld [vmem:[#allocation7] sm:$0xff] }
  0x16   :  { %v123_v13 = vsel %vm114_vm1, %v122_v10, 0.0  ;;  %v169_v55 = vld [vmem:[#allocation5 + $0x1] sm:$0x1]  ;;  %v288_v63 = vld [vmem:[#allocation8 + $0x70] sm:$0xff]  ;;  %v287_v0 = vld [vmem:[#allocation8 + $0x68] sm:$0xff]  ;;  %s495_s2 = smov [#allocation10]  }
  0x17   :  { %v82_v3 = vadd.s32 24, %v79_v1  ;;  %v85_v4 = vmul.u32 8, %v84_v2  ;;  %v81_v5 = vadd.s32 16, %v79_v1  ;;  %v80_v6 = vadd.s32 8, %v79_v1  ;;  %242 = vmatpush.msra.mxu2 %v223_v43  ;;  %266 = vmatpush.msra.mxu3 %v223_v43  ;;  %v289_v62 = vld [vmem:[#allocation8 + $0x78] sm:$0xff]  ;;  %v278_v10 = vld [vmem:[#allocation8 + $0x20] sm:$0xff] }
  0x18   :  { %v117_v14 = vadd.f32 %v116_v12, %v115_v9  ;;  %v124_v15 = vrot.slane %v123_v13, 4  ;;  %v107_v34 = vmul.u32 8, %v79_v1  ;;  %290 = vmatpush.msra.mxu1 %v289_v62  ;;  %v279_v9 = vld [vmem:[#allocation8 + $0x28] sm:$0xff]  ;;  %s316_s3 = sshll.u32 %s495_s2, 4  ;;  %s318_s11 = sshll.u32 %s553_s4, 4  ;;  %s317_s3 = int_to_ptr.vmem [resolvable:$true] %s316_s3  ;;  %s319_s11 = int_to_ptr.hbm [resolvable:$true] %s318_s11 }
  0x19   :  { %vm89_vm0 = vcmp.ge.s32.totalorder %v82_v3, %v85_v4  ;;  %v90_v7 = vadd.s32 8, %v85_v4  ;;  %vm88_vm2 = vcmp.ge.s32.totalorder %v81_v5, %v85_v4  ;;  %vm87_vm5 = vcmp.ge.s32.totalorder %v80_v6, %v85_v4  ;;  %243 = vmatpush.msra.mxu2 %v222_v60  ;;  %267 = vmatpush.msra.mxu3 %v222_v60 }
  0x1a   :  { %vm86_vm9 = vcmp.ge.s32.totalorder %v79_v1, %v85_v4  ;;  %v118_v16 = vrot.slane %v117_v14, 2  ;;  %v125_v17 = vadd.f32 %v124_v15, %v123_v13  ;;  %v109_v36 = vadd.s32 8, %v107_v34  ;;  %291 = vmatpush.msra.mxu1 %v288_v63  ;;  %v283_v4 = vld [vmem:[#allocation8 + $0x48] sm:$0xff]  ;;  %v277_v15 = vld [vmem:[#allocation8 + $0x18] sm:$0xff] }
  0x1b   :  { %vm94_vm3 = vcmp.lt.s32.totalorder %v82_v3, %v90_v7  ;;  %vm93_vm4 = vcmp.lt.s32.totalorder %v81_v5, %v90_v7  ;;  %vm92_vm6 = vcmp.lt.s32.totalorder %v80_v6, %v90_v7  ;;  %vm91_vm10 = vcmp.lt.s32.totalorder %v79_v1, %v90_v7  ;;  %v355_v27 = vpop.eup %354  ;;  %244 = vmatpush.msra.mxu2 %v221_v61  ;;  %v286_v1 = vld [vmem:[#allocation8 + $0x60] sm:$0xff]  ;;  %v284_v3 = vld [vmem:[#allocation8 + $0x50] sm:$0xff]  ;;  %v281_v6 = vld [vmem:[#allocation8 + $0x38] sm:$0xff] }
  0x1c   :  { %vm98_vm7 = vmand %vm89_vm0, %vm94_vm3  ;;  %v119_v18 = vadd.f32 %v118_v16, %v117_v14  ;;  %v126_v19 = vrot.slane %v125_v17, 2  ;;  %v156_v28 = vmul.f32 16.0, %v355_v27  ;;  %vm160_vm14 = vweird.f32 %v355_v27  ;;  %268 = vmatpush.msra.mxu3 %v221_v61  ;;  %292 = vmatpush.msra.mxu1 %v287_v0  ;;  %v282_v5 = vld [vmem:[#allocation8 + $0x40] sm:$0xff]  ;;  %v280_v7 = vld [vmem:[#allocation8 + $0x30] sm:$0xff] }
  0x1d   :  { %335 = vmatpush.msk.msra.mxu0 %vm98_vm7, %v492_v11  ;;  %vm97_vm8 = vmand %vm88_vm2, %vm93_vm4  ;;  %vm108_vm15 = vcmp.ge.s32.totalorder %v84_v2, %v107_v34  ;;  %vm110_vm0 = vcmp.lt.s32.totalorder %v84_v2, %v109_v36  ;;  %vm195_vm3 = vcmask 1043456   ;;  %vm191_vm7 = vcmask 31744   ;;  %v285_v2 = vld [vmem:[#allocation8 + $0x58] sm:$0xff]  ;;  %v276_v16 = vld [vmem:[#allocation8 + $0x10] sm:$0xff] }
  0x1e   :  { %vm96_vm11 = vmand %vm87_vm5, %vm92_vm6  ;;  %v120_v20 = vrot.slane %v119_v18, 1  ;;  %v127_v21 = vadd.f32 %v126_v19, %v125_v17  ;;  %v157_v29 = vsub.f32 1.0, %v156_v28  ;;  %293 = vmatpush.msra.mxu1 %v286_v1  ;;  %v275_v17 = vld [vmem:[#allocation8 + $0x8] sm:$0xff] }
  0x1f   :  { %336 = vmatpush.msk.msra.mxu0 %vm97_vm8, %v492_v11  ;;  %vm95_vm12 = vmand %vm86_vm9, %vm91_vm10 }
  0x20   :  { %v121_v22 = vadd.f32 %v120_v20, %v119_v18  ;;  %v128_v23 = vrot.slane %v127_v21, 1  ;;  %v158_v30 = vmul.f32 %v355_v27, %v157_v29  ;;  %vm111_vm2 = vmand %vm108_vm15, %vm110_vm0  ;;  %294 = vmatpush.msra.mxu1 %v285_v2  ;;  %v274_v18 = vld [vmem:[#allocation8] sm:$0xff] }
  0x21   :  { %337 = vmatpush.msk.msra.mxu0 %vm96_vm11, %v492_v11  ;;  %v334_v40 = vsel %vm111_vm2, 1.0, %v494_v39 }
  0x22   :  { %v129_v24 = vadd.f32 %v128_v23, %v127_v21  ;;  %v159_v31 = vadd.f32 %v355_v27, %v158_v30  ;;  %295 = vmatpush.msra.mxu1 %v284_v3 }
  0x23   :  { %338 = vmatpush.msk.msra.mxu0 %vm95_vm12, %v492_v11 }
  0x24   :  { %v131_v25 = vsel %vm130_vm13, %v121_v22, %v129_v24  ;;  %v161_v32 = vsel %vm160_vm14, %v355_v27, %v159_v31  ;;  %296 = vmatpush.msra.mxu1 %v283_v4 }
  0x25   :  { %339 = vmatmul.msk.f32.vlgmr.msra.gmra.mxu0 %vm114_vm1, %v131_v25 }
  0x26   :  { %340 = vmatpush.msk.msrb.mxu0 %vm195_vm3, %v334_v40  ;;  %297 = vmatpush.msra.mxu1 %v282_v5 }
  0x28   :  { %298 = vmatpush.msra.mxu1 %v281_v6 }
  0x2a   :  { %299 = vmatpush.msra.mxu1 %v280_v7 }
  0x2c   :  { %300 = vmatpush.msra.mxu1 %v279_v9 }
  0x2e   :  { %301 = vmatpush.msra.mxu1 %v278_v10 }
  0x30   :  { %302 = vmatpush.msra.mxu1 %v277_v15 }
  0x32   :  { %303 = vmatpush.msra.mxu1 %v276_v16 }
  0x34   :  { %304 = vmatpush.msra.mxu1 %v275_v17 }
  0x36   :  { %305 = vmatpush.msra.mxu1 %v274_v18 }
  0xa2   :  { %v152_v33 = vpop.f32.mrf.mxu0 }
  0xa3   :  { %v162_v35 = vmul.f32 %v161_v32, %v152_v33 }
  0xa5   :  { %v163_v37 = vmul.f32 %v162_v35, %v162_v35 }
  0xa7   :  { %v165_v38 = vrot.slane %v163_v37, 7 }
  0xa9   :  { %v167_v41 = vsub.f32 %v162_v35, %v165_v38 }
  0xab   :  { %v170_v44 = vadd.f32 1e-05, %v167_v41 }
  0xad   :  { %356 = vrsqrt.f32 %v170_v44  ;;  %vm177_vm5 = vweird.f32 %v170_v44 }
  0xb3   :  { %v357_v45 = vpop.eup %356 }
  0xb4   :  { %v172_v46 = vmul.f32 %v357_v45, %v170_v44  ;;  %vm178_vm4 = vweird.f32 %v357_v45 }
  0xb5   :  { %vm179_vm6 = vmor %vm177_vm5, %vm178_vm4 }
  0xb6   :  { %v173_v47 = vmul.f32 %v357_v45, %v172_v46 }
  0xb8   :  { %v174_v48 = vmul.f32 0.5, %v173_v47 }
  0xba   :  { %v175_v49 = vsub.f32 1.5, %v174_v48 }
  0xbc   :  { %v176_v50 = vmul.f32 %v357_v45, %v175_v49 }
  0xbe   :  { %v180_v52 = vsel %vm179_vm6, %v357_v45, %v176_v50 }
  0xbf   :  { %v182_v53 = vrot.slane %v180_v52, 1 }
  0xc1   :  { %v184_v54 = vmul.f32 %v182_v53, %v168_v51 }
  0xc3   :  { %v185_v56 = vmul.f32 %v184_v54, %v162_v35 }
  0xc5   :  { %v186_v57 = vsub.f32 %v169_v55, %v185_v56 }
  0xc7   :  { %v188_v58 = vrot.slane %v186_v57, 7 }
  0xc9   :  { %v190_v59 = vsel %vm130_vm13, %v184_v54, %v188_v58 }
  0xca   :  { %341 = vmatmul.msk.f32.vlgmr.msrb.gmra.mxu0 %vm191_vm7, %v190_v59 }
 0x147   :  { %v216_v11 = vpop.f32.mrf.mxu0 }
 0x148   :  { %v219_v12 = vperm.slane %v216_v11, 0  ;;  %v226_v13 = vrot.slane %v216_v11, 1 }
 0x14a   :  { %v220_v14 = vmul.f32 %v219_v12, %v533_v8  ;;  %342 = vmatmul.msk.f32.vlgmr.msra.gmra.mxu2 %vm114_vm1, %v226_v13 }
 0x14c   :  { %343 = vmatmul.msk.f32.vlgmr.msra.gmra.mxu3 %vm114_vm1, %v220_v14 }
 0x1cd   :  { %v246_v19 = vpop.f32.mrf.mxu2 }
 0x1ce   :  { %v249_v20 = vperm.slane %v246_v19, 0 }
 0x1cf   :  { %v270_v21 = vpop.f32.mrf.mxu3 }
 0x1d0   :  { %v271_v22 = vadd.f32 %v270_v21, %v249_v20 }
 0x1d2   :  { %v273_v23 = vmax.f32 %v271_v22, 0.0 }
 0x1d4   :  { %306 = vmatmul.f32.vlgmr.msra.gmra.mxu1 %v273_v23 }
 0x251   :  { %v307_v8 = vpop.f32.mrf.mxu1 }
 0x252   :  { %310 = vst [vmem:[#allocation10] sm:$0xff] %v307_v8 }
 0x253   :  { %321 = dma.vmem_to_hbm [thread:$0]  %s317_s3, 128, %s319_s11, [#allocation4]  }
 0x254   :  { %484 = dma.done.wait [#allocation4], 128  }
 0x255   :  { %485 = vsyncadd [#allocation4], 4294967168 }
 0x256   :  { %326 = vsyncpa [#allocation3], 1 }
 0x257   :  { %327 = vsyncpa [#allocation6], 1 }
 0x258   :  { %328 = vsyncpa [#allocation9], 1 }
 0x259   :  { %329 = vsyncpa [#allocation4], 1 }

</bundles_post_ra>
